<compile_context>
chip_gen: v6e
topology: v6e:2x2x1
jax: 0.10.0
libtpu: 0.0.40
codegen_flags: <defaults>
</compile_context>

<pallas_src>
import jax
import jax.numpy as jnp
from jax.experimental import pallas as pl
from jax.experimental.pallas import tpu as pltpu


def _round_up(x, m):
    return ((x + m - 1) // m) * m


def _icm_fused_kernel(
    state_ref, next_state_ref, action_ref,
    # forward-model head (predict_module): fc1 split, fc2, fc3 (output-padded)
    w1p_s_ref, w1p_a_ref, b1p_ref, w2p_ref, b2p_ref, w3p_ref,
    # inverse-model head (inv_predict_module): fc1 split, fc2, fc3 (output-padded)
    w1i_s_ref, w1i_n_ref, b1i_ref, w2i_ref, b2i_ref, w3i_ref,
    b3_ref,
    o_ref,
):
    s = state_ref[...].astype(jnp.float32)
    ns = next_state_ref[...].astype(jnp.float32)
    a = action_ref[...].astype(jnp.float32)

    # --- head 1: next_state_predict = predict(cat(state, action)) ---
    h = (jnp.dot(s, w1p_s_ref[...], preferred_element_type=jnp.float32)
         + jnp.dot(a, w1p_a_ref[...], preferred_element_type=jnp.float32)
         + b1p_ref[...])
    h = jnp.maximum(h, 0.0)
    h = jnp.dot(h, w2p_ref[...], preferred_element_type=jnp.float32) + b2p_ref[...]
    h = jnp.maximum(h, 0.0)
    # w3p_ref is (H, OUT_PAD) with non-zero columns only in [0:S]
    y = jnp.dot(h, w3p_ref[...], preferred_element_type=jnp.float32)

    # --- head 2: action_predict = inv_predict(cat(state, next_state)) ---
    g = (jnp.dot(s, w1i_s_ref[...], preferred_element_type=jnp.float32)
         + jnp.dot(ns, w1i_n_ref[...], preferred_element_type=jnp.float32)
         + b1i_ref[...])
    g = jnp.maximum(g, 0.0)
    g = jnp.dot(g, w2i_ref[...], preferred_element_type=jnp.float32) + b2i_ref[...]
    g = jnp.maximum(g, 0.0)
    # w3i_ref is (H, OUT_PAD) with non-zero columns only in [S:S+A]
    y = y + jnp.dot(g, w3i_ref[...], preferred_element_type=jnp.float32)

    # Single lane-dense store of both heads (+ packed final biases).
    o_ref[...] = (y + b3_ref[...]).astype(o_ref.dtype)


def icm_forward(params, state, next_state, action, *, tile_b=512):
    """ICM.forward (DNN variant), fused into one Pallas kernel.

    Returns (next_state_predict, action_predict)."""
    predict_params, inv_predict_params = params
    w1p, b1p, w2p, b2p, w3p, b3p = predict_params
    w1i, b1i, w2i, b2i, w3i, b3i = inv_predict_params

    B, S = state.shape
    A = action.shape[1]
    assert next_state.shape == (B, S)

    OUT = _round_up(max(S + A, 128), 128)   # lane-dense output slab width

    # Row-split first layer weights (removes the activation concatenate).
    w1p_s, w1p_a = w1p[:S], w1p[S:]
    w1i_s, w1i_n = w1i[:S], w1i[S:]

    # Column-pad last layer weights into the shared output slab:
    #   lanes [0:S]   -> next_state_predict,  lanes [S:S+A] -> action_predict
    w3p_pad = jnp.zeros((w3p.shape[0], OUT), jnp.float32).at[:, :S].set(w3p)
    w3i_pad = jnp.zeros((w3i.shape[0], OUT), jnp.float32).at[:, S:S + A].set(w3i)
    b3_pack = (jnp.zeros((1, OUT), jnp.float32)
               .at[:, :S].set(b3p)
               .at[:, S:S + A].set(b3i))

    # Batch tiling (pad batch to a multiple of the tile; tile is a multiple of 8).
    tile_b = min(tile_b, _round_up(B, 8))
    b_pad = _round_up(B, tile_b)
    if b_pad != B:
        pad = ((0, b_pad - B), (0, 0))
        state = jnp.pad(state, pad)
        next_state = jnp.pad(next_state, pad)
        action = jnp.pad(action, pad)
    grid = (b_pad // tile_b,)

    param_arrays = [w1p_s, w1p_a, b1p, w2p, b2p, w3p_pad,
                    w1i_s, w1i_n, b1i, w2i, b2i, w3i_pad, b3_pack]

    def batch_spec(n):
        return pl.BlockSpec((tile_b, n), lambda i: (i, 0))

    def param_spec(shape):
        # Constant block index -> weights stay resident in VMEM across the grid.
        return pl.BlockSpec(shape, lambda i: (0, 0))

    in_specs = ([batch_spec(S), batch_spec(S), batch_spec(A)]
                + [param_spec(tuple(p.shape)) for p in param_arrays])

    H1 = w1p.shape[1]   # hidden_dim * 2
    H2 = w2p.shape[1]   # hidden_dim
    flops = 2 * b_pad * (
        (S * H1 + A * H1 + H1 * H2 + H2 * OUT)       # head 1
        + (S * H1 + S * H1 + H1 * H2 + H2 * OUT))    # head 2
    bytes_accessed = 4 * (b_pad * (2 * S + A + OUT)
                          + sum(int(p.size) for p in param_arrays))

    out = pl.pallas_call(
        _icm_fused_kernel,
        out_shape=jax.ShapeDtypeStruct((b_pad, OUT), jnp.float32),
        grid=grid,
        in_specs=in_specs,
        out_specs=pl.BlockSpec((tile_b, OUT), lambda i: (i, 0)),
        compiler_params=pltpu.CompilerParams(
            dimension_semantics=("parallel",)),
        cost_estimate=pl.CostEstimate(
            flops=flops, transcendentals=0, bytes_accessed=bytes_accessed),
    )(state, next_state, action, *param_arrays)

    next_state_predict = out[:B, :S]
    action_predict = out[:B, S:S + A]
    return next_state_predict, action_predict


# ----------------------------- parameter init -----------------------------

def _init_linear(key, in_dim, out_dim):
    """PyTorch-style uniform(+/- 1/sqrt(in)) Linear init.
    Weight stored transposed: (in_dim, out_dim); bias as (1, out_dim)."""
    kw, kb = jax.random.split(key)
    bound = 1.0 / jnp.sqrt(jnp.float32(in_dim))
    w = jax.random.uniform(kw, (in_dim, out_dim), jnp.float32, -bound, bound)
    b = jax.random.uniform(kb, (1, out_dim), jnp.float32, -bound, bound)
    return w, b


def init_dnn_prediction(key, input_dim, hidden_dim, output_dim):
    k1, k2, k3 = jax.random.split(key, 3)
    w1, b1 = _init_linear(k1, input_dim, hidden_dim * 2)
    w2, b2 = _init_linear(k2, hidden_dim * 2, hidden_dim)
    w3, b3 = _init_linear(k3, hidden_dim, output_dim)
    return (w1, b1, w2, b2, w3, b3)


def init_icm_dnn(key, state_dim, action_dim, hidden_dim=32):
    k_pred, k_inv = jax.random.split(key)
    predict_params = init_dnn_prediction(
        k_pred, state_dim + action_dim, hidden_dim, state_dim)
    inv_predict_params = init_dnn_prediction(
        k_inv, state_dim + state_dim, hidden_dim, action_dim)
    return predict_params, inv_predict_params


# ----------------------------- reference check -----------------------------

def _reference_forward(params, state, next_state, action):
    def mlp(x, p):
        w1, b1, w2, b2, w3, b3 = p
        h = jnp.maximum(x @ w1 + b1, 0.0)
        h = jnp.maximum(h @ w2 + b2, 0.0)
        return h @ w3 + b3
    predict_params, inv_predict_params = params
    return (mlp(jnp.concatenate((state, action), axis=1), predict_params),
            mlp(jnp.concatenate((state, next_state), axis=1), inv_predict_params))


if __name__ == "__main__":
    batch = 8
    state_dim = 16
    action_dim = 4
    hidden_dim = 32

    key = jax.random.PRNGKey(0)
    k_params, k_s, k_ns, k_a = jax.random.split(key, 4)

    params = init_icm_dnn(k_params, state_dim, action_dim, hidden_dim)

    state = jax.random.normal(k_s, (batch, state_dim), jnp.float32)
    next_state = jax.random.normal(k_ns, (batch, state_dim), jnp.float32)
    action = jax.random.normal(k_a, (batch, action_dim), jnp.float32)

    next_state_predict, action_predict = icm_forward(params, state, next_state, action)
    jax.block_until_ready((next_state_predict, action_predict))

    ref_nsp, ref_ap = _reference_forward(params, state, next_state, action)
    assert next_state_predict.shape == (batch, state_dim)
    assert action_predict.shape == (batch, action_dim)
    assert jnp.allclose(next_state_predict, ref_nsp, atol=1e-4, rtol=1e-4)
    assert jnp.allclose(action_predict, ref_ap, atol=1e-4, rtol=1e-4)

    print("KERNEL_OK")
</pallas_src>

<mosaic_0001>
module attributes {stable_mosaic.version = 11 : i64} {
  func.func @_icm_fused_kernel(%arg0: i32, %arg1: memref<8x16xf32, #tpu.memory_space<vmem>>, %arg2: memref<8x16xf32, #tpu.memory_space<vmem>>, %arg3: memref<8x4xf32, #tpu.memory_space<vmem>>, %arg4: memref<16x64xf32, #tpu.memory_space<vmem>>, %arg5: memref<4x64xf32, #tpu.memory_space<vmem>>, %arg6: memref<1x64xf32, #tpu.memory_space<vmem>>, %arg7: memref<64x32xf32, #tpu.memory_space<vmem>>, %arg8: memref<1x32xf32, #tpu.memory_space<vmem>>, %arg9: memref<32x128xf32, #tpu.memory_space<vmem>>, %arg10: memref<16x64xf32, #tpu.memory_space<vmem>>, %arg11: memref<16x64xf32, #tpu.memory_space<vmem>>, %arg12: memref<1x64xf32, #tpu.memory_space<vmem>>, %arg13: memref<64x32xf32, #tpu.memory_space<vmem>>, %arg14: memref<1x32xf32, #tpu.memory_space<vmem>>, %arg15: memref<32x128xf32, #tpu.memory_space<vmem>>, %arg16: memref<1x128xf32, #tpu.memory_space<vmem>>, %arg17: memref<8x128xf32, #tpu.memory_space<vmem>>) attributes {dimension_semantics = [#tpu.dimension_semantics<parallel>], iteration_bounds = array<i64: 1>, scalar_prefetch = 0 : i64, scratch_operands = 0 : i64, tpu.core_type = #tpu.core_type<tc>, window_params = [{transform_indices = @transform_0, window_bounds = array<i64: 8, 16>}, {transform_indices = @transform_1, window_bounds = array<i64: 8, 16>}, {transform_indices = @transform_2, window_bounds = array<i64: 8, 4>}, {pipeline_mode = #tpu.pipeline_mode<synchronous>, transform_indices = @transform_3, window_bounds = array<i64: 16, 64>}, {pipeline_mode = #tpu.pipeline_mode<synchronous>, transform_indices = @transform_4, window_bounds = array<i64: 4, 64>}, {pipeline_mode = #tpu.pipeline_mode<synchronous>, transform_indices = @transform_5, window_bounds = array<i64: 1, 64>}, {pipeline_mode = #tpu.pipeline_mode<synchronous>, transform_indices = @transform_6, window_bounds = array<i64: 64, 32>}, {pipeline_mode = #tpu.pipeline_mode<synchronous>, transform_indices = @transform_7, window_bounds = array<i64: 1, 32>}, {pipeline_mode = #tpu.pipeline_mode<synchronous>, transform_indices = @transform_8, window_bounds = array<i64: 32, 128>}, {pipeline_mode = #tpu.pipeline_mode<synchronous>, transform_indices = @transform_9, window_bounds = array<i64: 16, 64>}, {pipeline_mode = #tpu.pipeline_mode<synchronous>, transform_indices = @transform_10, window_bounds = array<i64: 16, 64>}, {pipeline_mode = #tpu.pipeline_mode<synchronous>, transform_indices = @transform_11, window_bounds = array<i64: 1, 64>}, {pipeline_mode = #tpu.pipeline_mode<synchronous>, transform_indices = @transform_12, window_bounds = array<i64: 64, 32>}, {pipeline_mode = #tpu.pipeline_mode<synchronous>, transform_indices = @transform_13, window_bounds = array<i64: 1, 32>}, {pipeline_mode = #tpu.pipeline_mode<synchronous>, transform_indices = @transform_14, window_bounds = array<i64: 32, 128>}, {pipeline_mode = #tpu.pipeline_mode<synchronous>, transform_indices = @transform_15, window_bounds = array<i64: 1, 128>}, {transform_indices = @transform_16, window_bounds = array<i64: 8, 128>}]} {
    %c0 = arith.constant 0 : index
    %c0_0 = arith.constant 0 : index
    %0 = vector.load %arg1[%c0, %c0_0] : memref<8x16xf32, #tpu.memory_space<vmem>>, vector<8x16xf32>
    %c0_1 = arith.constant 0 : index
    %c0_2 = arith.constant 0 : index
    %1 = vector.load %arg2[%c0_1, %c0_2] : memref<8x16xf32, #tpu.memory_space<vmem>>, vector<8x16xf32>
    %c0_3 = arith.constant 0 : index
    %c0_4 = arith.constant 0 : index
    %2 = vector.load %arg3[%c0_3, %c0_4] : memref<8x4xf32, #tpu.memory_space<vmem>>, vector<8x4xf32>
    %c0_5 = arith.constant 0 : index
    %c0_6 = arith.constant 0 : index
    %3 = vector.load %arg4[%c0_5, %c0_6] : memref<16x64xf32, #tpu.memory_space<vmem>>, vector<16x64xf32>
    %cst = arith.constant dense<0.000000e+00> : vector<8x64xf32>
    %4 = tpu.matmul %0, %3, %cst {dimension_numbers = #tpu.dot_dimension_numbers<[1], [0], [0], [1], [0, 0, 1, 1], [], []>} : vector<8x16xf32>, vector<16x64xf32>, vector<8x64xf32> -> vector<8x64xf32>
    %c0_7 = arith.constant 0 : index
    %c0_8 = arith.constant 0 : index
    %5 = vector.load %arg5[%c0_7, %c0_8] : memref<4x64xf32, #tpu.memory_space<vmem>>, vector<4x64xf32>
    %cst_9 = arith.constant dense<0.000000e+00> : vector<8x64xf32>
    %6 = tpu.matmul %2, %5, %cst_9 {dimension_numbers = #tpu.dot_dimension_numbers<[1], [0], [0], [1], [0, 0, 1, 1], [], []>} : vector<8x4xf32>, vector<4x64xf32>, vector<8x64xf32> -> vector<8x64xf32>
    %7 = arith.addf %4, %6 : vector<8x64xf32>
    %c0_10 = arith.constant 0 : index
    %c0_11 = arith.constant 0 : index
    %8 = vector.load %arg6[%c0_10, %c0_11] : memref<1x64xf32, #tpu.memory_space<vmem>>, vector<1x64xf32>
    %9 = vector.broadcast %8 : vector<1x64xf32> to vector<8x64xf32>
    %10 = arith.addf %7, %9 : vector<8x64xf32>
    %cst_12 = arith.constant 0.000000e+00 : f32
    %11 = vector.broadcast %cst_12 : f32 to vector<8x64xf32>
    %12 = arith.maximumf %10, %11 : vector<8x64xf32>
    %c0_13 = arith.constant 0 : index
    %c0_14 = arith.constant 0 : index
    %13 = vector.load %arg7[%c0_13, %c0_14] : memref<64x32xf32, #tpu.memory_space<vmem>>, vector<64x32xf32>
    %cst_15 = arith.constant dense<0.000000e+00> : vector<8x32xf32>
    %14 = tpu.matmul %12, %13, %cst_15 {dimension_numbers = #tpu.dot_dimension_numbers<[1], [0], [0], [1], [0, 0, 1, 1], [], []>} : vector<8x64xf32>, vector<64x32xf32>, vector<8x32xf32> -> vector<8x32xf32>
    %c0_16 = arith.constant 0 : index
    %c0_17 = arith.constant 0 : index
    %15 = vector.load %arg8[%c0_16, %c0_17] : memref<1x32xf32, #tpu.memory_space<vmem>>, vector<1x32xf32>
    %16 = vector.broadcast %15 : vector<1x32xf32> to vector<8x32xf32>
    %17 = arith.addf %14, %16 : vector<8x32xf32>
    %cst_18 = arith.constant 0.000000e+00 : f32
    %18 = vector.broadcast %cst_18 : f32 to vector<8x32xf32>
    %19 = arith.maximumf %17, %18 : vector<8x32xf32>
    %c0_19 = arith.constant 0 : index
    %c0_20 = arith.constant 0 : index
    %20 = vector.load %arg9[%c0_19, %c0_20] : memref<32x128xf32, #tpu.memory_space<vmem>>, vector<32x128xf32>
    %cst_21 = arith.constant dense<0.000000e+00> : vector<8x128xf32>
    %21 = tpu.matmul %19, %20, %cst_21 {dimension_numbers = #tpu.dot_dimension_numbers<[1], [0], [0], [1], [0, 0, 1, 1], [], []>} : vector<8x32xf32>, vector<32x128xf32>, vector<8x128xf32> -> vector<8x128xf32>
    %c0_22 = arith.constant 0 : index
    %c0_23 = arith.constant 0 : index
    %22 = vector.load %arg10[%c0_22, %c0_23] : memref<16x64xf32, #tpu.memory_space<vmem>>, vector<16x64xf32>
    %cst_24 = arith.constant dense<0.000000e+00> : vector<8x64xf32>
    %23 = tpu.matmul %0, %22, %cst_24 {dimension_numbers = #tpu.dot_dimension_numbers<[1], [0], [0], [1], [0, 0, 1, 1], [], []>} : vector<8x16xf32>, vector<16x64xf32>, vector<8x64xf32> -> vector<8x64xf32>
    %c0_25 = arith.constant 0 : index
    %c0_26 = arith.constant 0 : index
    %24 = vector.load %arg11[%c0_25, %c0_26] : memref<16x64xf32, #tpu.memory_space<vmem>>, vector<16x64xf32>
    %cst_27 = arith.constant dense<0.000000e+00> : vector<8x64xf32>
    %25 = tpu.matmul %1, %24, %cst_27 {dimension_numbers = #tpu.dot_dimension_numbers<[1], [0], [0], [1], [0, 0, 1, 1], [], []>} : vector<8x16xf32>, vector<16x64xf32>, vector<8x64xf32> -> vector<8x64xf32>
    %26 = arith.addf %23, %25 : vector<8x64xf32>
    %c0_28 = arith.constant 0 : index
    %c0_29 = arith.constant 0 : index
    %27 = vector.load %arg12[%c0_28, %c0_29] : memref<1x64xf32, #tpu.memory_space<vmem>>, vector<1x64xf32>
    %28 = vector.broadcast %27 : vector<1x64xf32> to vector<8x64xf32>
    %29 = arith.addf %26, %28 : vector<8x64xf32>
    %cst_30 = arith.constant 0.000000e+00 : f32
    %30 = vector.broadcast %cst_30 : f32 to vector<8x64xf32>
    %31 = arith.maximumf %29, %30 : vector<8x64xf32>
    %c0_31 = arith.constant 0 : index
    %c0_32 = arith.constant 0 : index
    %32 = vector.load %arg13[%c0_31, %c0_32] : memref<64x32xf32, #tpu.memory_space<vmem>>, vector<64x32xf32>
    %cst_33 = arith.constant dense<0.000000e+00> : vector<8x32xf32>
    %33 = tpu.matmul %31, %32, %cst_33 {dimension_numbers = #tpu.dot_dimension_numbers<[1], [0], [0], [1], [0, 0, 1, 1], [], []>} : vector<8x64xf32>, vector<64x32xf32>, vector<8x32xf32> -> vector<8x32xf32>
    %c0_34 = arith.constant 0 : index
    %c0_35 = arith.constant 0 : index
    %34 = vector.load %arg14[%c0_34, %c0_35] : memref<1x32xf32, #tpu.memory_space<vmem>>, vector<1x32xf32>
    %35 = vector.broadcast %34 : vector<1x32xf32> to vector<8x32xf32>
    %36 = arith.addf %33, %35 : vector<8x32xf32>
    %cst_36 = arith.constant 0.000000e+00 : f32
    %37 = vector.broadcast %cst_36 : f32 to vector<8x32xf32>
    %38 = arith.maximumf %36, %37 : vector<8x32xf32>
    %c0_37 = arith.constant 0 : index
    %c0_38 = arith.constant 0 : index
    %39 = vector.load %arg15[%c0_37, %c0_38] : memref<32x128xf32, #tpu.memory_space<vmem>>, vector<32x128xf32>
    %cst_39 = arith.constant dense<0.000000e+00> : vector<8x128xf32>
    %40 = tpu.matmul %38, %39, %cst_39 {dimension_numbers = #tpu.dot_dimension_numbers<[1], [0], [0], [1], [0, 0, 1, 1], [], []>} : vector<8x32xf32>, vector<32x128xf32>, vector<8x128xf32> -> vector<8x128xf32>
    %41 = arith.addf %21, %40 : vector<8x128xf32>
    %c0_40 = arith.constant 0 : index
    %c0_41 = arith.constant 0 : index
    %42 = vector.load %arg16[%c0_40, %c0_41] : memref<1x128xf32, #tpu.memory_space<vmem>>, vector<1x128xf32>
    %43 = vector.broadcast %42 : vector<1x128xf32> to vector<8x128xf32>
    %44 = arith.addf %41, %43 : vector<8x128xf32>
    %c0_42 = arith.constant 0 : index
    %c0_43 = arith.constant 0 : index
    %45 = vector.load %arg17[%c0_42, %c0_43] : memref<8x128xf32, #tpu.memory_space<vmem>>, vector<8x128xf32>
    tpu.vector_store %arg17[%c0_42, %c0_43], %44 {strides = array<i32>} : memref<8x128xf32, #tpu.memory_space<vmem>>, vector<8x128xf32>,
    return
  }
  func.func @transform_0(%arg0: i32) -> (i32, i32) {
    %c0_i32 = arith.constant 0 : i32
    %c0_i32_0 = arith.constant 0 : i32
    return %arg0, %c0_i32 : i32, i32
  }
  func.func @transform_1(%arg0: i32) -> (i32, i32) {
    %c0_i32 = arith.constant 0 : i32
    %c0_i32_0 = arith.constant 0 : i32
    return %arg0, %c0_i32 : i32, i32
  }
  func.func @transform_2(%arg0: i32) -> (i32, i32) {
    %c0_i32 = arith.constant 0 : i32
    %c0_i32_0 = arith.constant 0 : i32
    return %arg0, %c0_i32 : i32, i32
  }
  func.func @transform_3(%arg0: i32) -> (i32, i32) {
    %c0_i32 = arith.constant 0 : i32
    %c0_i32_0 = arith.constant 0 : i32
    %c0_i32_1 = arith.constant 0 : i32
    return %c0_i32, %c0_i32_0 : i32, i32
  }
  func.func @transform_4(%arg0: i32) -> (i32, i32) {
    %c0_i32 = arith.constant 0 : i32
    %c0_i32_0 = arith.constant 0 : i32
    %c0_i32_1 = arith.constant 0 : i32
    return %c0_i32, %c0_i32_0 : i32, i32
  }
  func.func @transform_5(%arg0: i32) -> (i32, i32) {
    %c0_i32 = arith.constant 0 : i32
    %c0_i32_0 = arith.constant 0 : i32
    %c0_i32_1 = arith.constant 0 : i32
    return %c0_i32, %c0_i32_0 : i32, i32
  }
  func.func @transform_6(%arg0: i32) -> (i32, i32) {
    %c0_i32 = arith.constant 0 : i32
    %c0_i32_0 = arith.constant 0 : i32
    %c0_i32_1 = arith.constant 0 : i32
    return %c0_i32, %c0_i32_0 : i32, i32
  }
  func.func @transform_7(%arg0: i32) -> (i32, i32) {
    %c0_i32 = arith.constant 0 : i32
    %c0_i32_0 = arith.constant 0 : i32
    %c0_i32_1 = arith.constant 0 : i32
    return %c0_i32, %c0_i32_0 : i32, i32
  }
  func.func @transform_8(%arg0: i32) -> (i32, i32) {
    %c0_i32 = arith.constant 0 : i32
    %c0_i32_0 = arith.constant 0 : i32
    %c0_i32_1 = arith.constant 0 : i32
    return %c0_i32, %c0_i32_0 : i32, i32
  }
  func.func @transform_9(%arg0: i32) -> (i32, i32) {
    %c0_i32 = arith.constant 0 : i32
    %c0_i32_0 = arith.constant 0 : i32
    %c0_i32_1 = arith.constant 0 : i32
    return %c0_i32, %c0_i32_0 : i32, i32
  }
  func.func @transform_10(%arg0: i32) -> (i32, i32) {
    %c0_i32 = arith.constant 0 : i32
    %c0_i32_0 = arith.constant 0 : i32
    %c0_i32_1 = arith.constant 0 : i32
    return %c0_i32, %c0_i32_0 : i32, i32
  }
  func.func @transform_11(%arg0: i32) -> (i32, i32) {
    %c0_i32 = arith.constant 0 : i32
    %c0_i32_0 = arith.constant 0 : i32
    %c0_i32_1 = arith.constant 0 : i32
    return %c0_i32, %c0_i32_0 : i32, i32
  }
  func.func @transform_12(%arg0: i32) -> (i32, i32) {
    %c0_i32 = arith.constant 0 : i32
    %c0_i32_0 = arith.constant 0 : i32
    %c0_i32_1 = arith.constant 0 : i32
    return %c0_i32, %c0_i32_0 : i32, i32
  }
  func.func @transform_13(%arg0: i32) -> (i32, i32) {
    %c0_i32 = arith.constant 0 : i32
    %c0_i32_0 = arith.constant 0 : i32
    %c0_i32_1 = arith.constant 0 : i32
    return %c0_i32, %c0_i32_0 : i32, i32
  }
  func.func @transform_14(%arg0: i32) -> (i32, i32) {
    %c0_i32 = arith.constant 0 : i32
    %c0_i32_0 = arith.constant 0 : i32
    %c0_i32_1 = arith.constant 0 : i32
    return %c0_i32, %c0_i32_0 : i32, i32
  }
  func.func @transform_15(%arg0: i32) -> (i32, i32) {
    %c0_i32 = arith.constant 0 : i32
    %c0_i32_0 = arith.constant 0 : i32
    %c0_i32_1 = arith.constant 0 : i32
    return %c0_i32, %c0_i32_0 : i32, i32
  }
  func.func @transform_16(%arg0: i32) -> (i32, i32) {
    %c0_i32 = arith.constant 0 : i32
    %c0_i32_0 = arith.constant 0 : i32
    return %arg0, %c0_i32 : i32, i32
  }
}

</mosaic_0001>

<bundles_post_ra>
// kernel: tpu_custom_call.1
= control target key start
LH: loop header
LB: loop body
LE: loop exit
PB: predicated region body
PF: predicated region fallthrough
CT: control target
= control target key end

     0   :  { %s1158_s0 = inlined_call_operand.vmem [shape: f32[8,16], index: 0, kind: input, shape index: {}]   ;;  %s1159_s1 = inlined_call_operand.vmem [shape: f32[8,16], index: 1, kind: input, shape index: {}]   ;;  %s1160_s2 = inlined_call_operand.vmem [shape: f32[8,4], index: 2, kind: input, shape index: {}]   ;;  %s1161_s3 = inlined_call_operand.vmem [shape: f32[16,64], index: 3, kind: input, shape index: {}]   ;;  %s1162_s4 = inlined_call_operand.vmem [shape: f32[4,64], index: 4, kind: input, shape index: {}]   ;;  %s1163_s5 = inlined_call_operand.vmem [shape: f32[1,64], index: 5, kind: input, shape index: {}]   ;;  %s1164_s6 = inlined_call_operand.vmem [shape: f32[64,32], index: 6, kind: input, shape index: {}]   ;;  %s1165_s7 = inlined_call_operand.vmem [shape: f32[1,32], index: 7, kind: input, shape index: {}]   ;;  %s1166_s8 = inlined_call_operand.vmem [shape: f32[32,128], index: 8, kind: input, shape index: {}]   ;;  %s1167_s9 = inlined_call_operand.vmem [shape: f32[16,64], index: 9, kind: input, shape index: {}]   ;;  %s1168_s10 = inlined_call_operand.vmem [shape: f32[16,64], index: 10, kind: input, shape index: {}]   ;;  %s1169_s11 = inlined_call_operand.vmem [shape: f32[1,64], index: 11, kind: input, shape index: {}]   ;;  %s1170_s12 = inlined_call_operand.vmem [shape: f32[64,32], index: 12, kind: input, shape index: {}]   ;;  %s1171_s13 = inlined_call_operand.vmem [shape: f32[1,32], index: 13, kind: input, shape index: {}]   ;;  %s1172_s14 = inlined_call_operand.vmem [shape: f32[32,128], index: 14, kind: input, shape index: {}]   ;;  %s1173_s15 = inlined_call_operand.vmem [shape: f32[1,128], index: 15, kind: input, shape index: {}]   ;;  %s1174_s16 = inlined_call_operand.hbm [shape: f32[8,128], index: 16, kind: output, shape index: {}]  }
   0x1   :  { %1175 = sst [smem:[#allocation5_spill]] %s1158_s0 }
   0x2   :  { %v59_v0 = vld [vmem:[%s1162_s4] sm:$0xf]  ;;  %vm64_vm0 = vcmask 1043456   ;;  %v898_v2 = vmov 0.0   ;;  %vm899_vm1 = vmmov 0   ;;  %vm60_vm2 = vcmask 31744  }
   0x3   :  { %v56_v1 = vld [vmem:[%s1160_s2] sm:$0xff]  ;;  %787 = vmatprep.subr.mxu1 %v898_v2  ;;  %789 = vmatprep.mubr.msk.f32.mxu1 %vm899_vm1, %v898_v2  ;;  %v58_v3 = vld [vmem:[%s1161_s3 + $0x8] sm:$0xff]  ;;  %v228_v5 = vld [vmem:[%s1164_s6 + $0x38] sm:$0xff]  ;;  %s1176_s0 = sld [smem:[#allocation5_spill]]  ;;  %vm138_vm3 = vcmask 130048  }
   0x4   :  { %788 = vmatpush3.msk.msra.mxu1 %vm64_vm0, %v59_v0  ;;  %799 = vmatprep.subr.mxu0 %v898_v2  ;;  %v57_v4 = vld [vmem:[%s1161_s3] sm:$0xff] }
   0x5   :  { %790 = vmatmul.mubr.msk.f32.vlgmr.msra.gmra.mxu1 %vm60_vm2, %v56_v1  ;;  %792 = vmatprep.subr.mxu1 %v898_v2 }
   0x6   :  { %793 = vmatpush3.msra.mxu1 %v58_v3  ;;  %796 = vmatprep.mubr.msk.f32.mxu1 %vm899_vm1, %v898_v2 }
   0x9   :  { %v54_v6 = vld [vmem:[%s1176_s0] sm:$0xff] }
   0xa   :  { %21 = vsyncpa [#allocation3], 0  ;;  %794 = vmatprep.subr.mxu1 %v898_v2  ;;  %v318_v7 = vld [vmem:[%s1168_s10 + $0x8] sm:$0xff]  ;;  %800 = vmatpush3.msra.mxu0 %v228_v5  ;;  %v227_v8 = vld [vmem:[%s1164_s6 + $0x30] sm:$0xff]  ;;  %vm236_vm4 = vcmask 523264   ;;  %vm564_vm5 = vcmask 261120  }
   0xb   :  { %795 = vmatpush3.msra.mxu1 %v57_v4  ;;  %801 = vmatprep.subr.mxu0 %v898_v2  ;;  %v317_v9 = vld [vmem:[%s1168_s10] sm:$0xff]  ;;  %v316_v11 = vld [vmem:[%s1167_s9 + $0x8] sm:$0xff]  ;;  %v224_v15 = vld [vmem:[%s1164_s6 + $0x18] sm:$0xff]  ;;  %s900_s27 = smov [#allocation2]  }
   0xc   :  { %797 = vmatmul.mubr.msk.f32.vlgmr.msra.gmra.mxu1 %vm138_vm3, %v54_v6  ;;  %818 = vmatprep.subr.mxu1 %v898_v2  ;;  %v55_v10 = vld [vmem:[%s1159_s1] sm:$0xff]  ;;  %v226_v13 = vld [vmem:[%s1164_s6 + $0x28] sm:$0xff]  ;;  %v478_v16 = vld [vmem:[%s1170_s12 + $0x38] sm:$0xff]  ;;  %s726_s28 = sshll.u32 %s900_s27, 4  ;;  %s727_s28 = int_to_ptr.vmem [resolvable:$true] %s726_s28 }
   0xd   :  { %819 = vmatpush3.msra.mxu1 %v318_v7  ;;  %822 = vmatprep.mubr.msk.f32.mxu1 %vm899_vm1, %v898_v2  ;;  %v315_v12 = vld [vmem:[%s1167_s9] sm:$0xff]  ;;  %v223_v17 = vld [vmem:[%s1164_s6 + $0x10] sm:$0xff]  ;;  %v222_v19 = vld [vmem:[%s1164_s6 + $0x8] sm:$0xff]  ;;  %p881_p1 = scmp.lt.s32.totalorder %s727_s28, %s727_s28 }
   0xe   :  { %820 = vmatprep.subr.mxu1 %v898_v2  ;;  %802 = vmatpush3.msra.mxu0 %v227_v8  ;;  %v225_v14 = vld [vmem:[%s1164_s6 + $0x20] sm:$0xff]  ;;  %v477_v18 = vld [vmem:[%s1170_s12 + $0x30] sm:$0xff]  ;;  %v476_v20 = vld [vmem:[%s1170_s12 + $0x28] sm:$0xff] }
   0xf   :  { %821 = vmatpush3.msra.mxu1 %v317_v9  ;;  %803 = vmatprep.subr.mxu0 %v898_v2  ;;  %v221_v21 = vld [vmem:[%s1164_s6] sm:$0xff]  ;;  %v474_v23 = vld [vmem:[%s1170_s12 + $0x18] sm:$0xff]  ;;  %v473_v24 = vld [vmem:[%s1170_s12 + $0x10] sm:$0xff] }
  0x10   :  { %823 = vmatmul.mubr.msk.f32.vlgmr.msra.gmra.mxu1 %vm138_vm3, %v55_v10  ;;  %825 = vmatprep.subr.mxu1 %v898_v2  ;;  %v475_v22 = vld [vmem:[%s1170_s12 + $0x20] sm:$0xff]  ;;  %v472_v25 = vld [vmem:[%s1170_s12 + $0x8] sm:$0xff]  ;;  %v563_v43 = vld [vmem:[%s1172_s14 + $0x18] sm:$0xff] }
  0x11   :  { %826 = vmatpush3.msra.mxu1 %v316_v11  ;;  %829 = vmatprep.mubr.msk.f32.mxu1 %vm899_vm1, %v898_v2  ;;  %v471_v26 = vld [vmem:[%s1170_s12] sm:$0xff]  ;;  %v562_v44 = vld [vmem:[%s1172_s14 + $0x10] sm:$0xff]  ;;  %v561_v45 = vld [vmem:[%s1172_s14 + $0x8] sm:$0xff] }
  0x12   :  { %827 = vmatprep.subr.mxu1 %v898_v2  ;;  %815 = vmatprep.mubr.msk.f32.mxu0 %vm899_vm1, %v898_v2  ;;  %v737_v30 = vld [vmem:[%s1163_s5] ss:$0 sm:$0xff]  ;;  %v314_v54 = vld [vmem:[%s1166_s8 + $0x18] sm:$0xff]  ;;  %v313_v56 = vld [vmem:[%s1166_s8 + $0x10] sm:$0xff] }
  0x13   :  { %828 = vmatpush3.msra.mxu1 %v315_v12  ;;  %804 = vmatpush3.msra.mxu0 %v226_v13  ;;  %v742_v38 = vld [vmem:[%s1169_s11] ss:$0 sm:$0xff]  ;;  %v312_v58 = vld [vmem:[%s1166_s8 + $0x8] sm:$0xff] }
  0x14   :  { %830 = vmatmul.mubr.msk.f32.vlgmr.msra.gmra.mxu1 %vm138_vm3, %v54_v6  ;;  %832 = vmatprep.subr.mxu1 %v898_v2  ;;  %v560_v46 = vld [vmem:[%s1172_s14] sm:$0xff] }
  0x15   :  { %848 = vmatprep.mubr.msk.f32.mxu1 %vm899_vm1, %v898_v2  ;;  %805 = vmatprep.subr.mxu0 %v898_v2  ;;  %v743_v49 = vld [vmem:[%s1171_s13] ss:$0 sm:$0xff] }
  0x16   :  { %806 = vmatpush3.msra.mxu0 %v225_v14  ;;  %833 = vmatpush3.msra.mxu1 %v478_v16  ;;  %v738_v55 = vld [vmem:[%s1165_s7] ss:$0 sm:$0xff] }
  0x17   :  { %807 = vmatprep.subr.mxu0 %v898_v2  ;;  %834 = vmatprep.subr.mxu1 %v898_v2  ;;  %v311_v59 = vld [vmem:[%s1166_s8] sm:$0xff]  ;;  %s876_s8 = scalar_lea.vmem %s727_s28, 128 }
  0x18   :  { %808 = vmatpush3.msra.mxu0 %v224_v15  ;;  %835 = vmatpush3.msra.mxu1 %v477_v18  ;;  %v747_v0 = vld [vmem:[%s1173_s15] ss:$0 sm:$0xff]  ;;  %p877_p0 = scmp.ne.s32.totalorder %s727_s28, %s876_s8  ;;  %p882_p2 = scmp.lt.s32.totalorder %s876_s8, %s876_s8 }
  0x19   :  { %809 = vmatprep.subr.mxu0 %v898_v2  ;;  %836 = vmatprep.subr.mxu1 %v898_v2 }
  0x1a   :  { %810 = vmatpush3.msra.mxu0 %v223_v17  ;;  %837 = vmatpush3.msra.mxu1 %v476_v20  ;;  %p883_p3 = por %p882_p2, %p881_p1 }
  0x1b   :  { %811 = vmatprep.subr.mxu0 %v898_v2  ;;  %838 = vmatprep.subr.mxu1 %v898_v2 }
  0x1c   :  { %812 = vmatpush3.msra.mxu0 %v222_v19  ;;  %839 = vmatpush3.msra.mxu1 %v475_v22  ;;  %p884_p4 = pnand %p883_p3, %p877_p0 }
  0x1d   :  { %813 = vmatprep.subr.mxu0 %v898_v2  ;;  %840 = vmatprep.subr.mxu1 %v898_v2 }
  0x1e   :  { %814 = vmatpush3.msra.mxu0 %v221_v21  ;;  %841 = vmatpush3.msra.mxu1 %v474_v23 }
  0x1f   :  { %851 = vmatprep.subr.mxu0 %v898_v2  ;;  %842 = vmatprep.subr.mxu1 %v898_v2 }
  0x20   :  { %843 = vmatpush3.msra.mxu1 %v473_v24 }
  0x21   :  { %844 = vmatprep.subr.mxu1 %v898_v2 }
  0x22   :  { %845 = vmatpush3.msra.mxu1 %v472_v25 }
  0x23   :  { %846 = vmatprep.subr.mxu1 %v898_v2 }
  0x24   :  { %847 = vmatpush3.msra.mxu1 %v471_v26 }
  0xc5   :  { %v134_v27 = vpop.f32.mrf.mxu1 }
  0xc7   :  { %v791_v28 = vpop.f32.mrf.mxu1 }
  0xcc   :  { %v208_v29 = vpop.f32.mrf.mxu1 }
  0xcd   :  { %v209_v31 = vadd.f32 %v208_v29, %v134_v27 }
  0xce   :  { %v798_v32 = vpop.f32.mrf.mxu1 }
  0xcf   :  { %v219_v33 = vadd.f32 %v737_v30, %v209_v31 }
  0xd0   :  { %v388_v34 = vpop.f32.mrf.mxu1 }
  0xd1   :  { %v220_v35 = vmax.f32 %v219_v33, 0.0 }
  0xd2   :  { %v824_v36 = vpop.f32.mrf.mxu1 }
  0xd3   :  { %816 = vmatmul.mubr.msk.f32.vlgmr.msra.gmra.mxu0 %vm236_vm4, %v220_v35 }
  0xd4   :  { %v458_v37 = vpop.f32.mrf.mxu1  ;;  %859 = vmatprep.mubr.msk.f32.mxu0 %vm899_vm1, %v898_v2  ;;  %852 = vmatpush3.msra.mxu0 %v563_v43 }
  0xd5   :  { %v459_v39 = vadd.f32 %v458_v37, %v388_v34  ;;  %853 = vmatprep.subr.mxu0 %v898_v2 }
  0xd6   :  { %v831_v40 = vpop.f32.mrf.mxu1  ;;  %854 = vmatpush3.msra.mxu0 %v562_v44 }
  0xd7   :  { %v469_v41 = vadd.f32 %v742_v38, %v459_v39  ;;  %855 = vmatprep.subr.mxu0 %v898_v2 }
  0xd8   :  { %856 = vmatpush3.msra.mxu0 %v561_v45 }
  0xd9   :  { %v470_v42 = vmax.f32 %v469_v41, 0.0  ;;  %857 = vmatprep.subr.mxu0 %v898_v2 }
  0xda   :  { %858 = vmatpush3.msra.mxu0 %v560_v46 }
  0xdb   :  { %849 = vmatmul.mubr.msk.f32.vlgmr.msra.gmra.mxu1 %vm236_vm4, %v470_v42  ;;  %862 = vmatprep.subr.mxu0 %v898_v2 }
 0x193   :  { %v306_v47 = vpop.f32.mrf.mxu0 }
 0x194   :  { %v307_v57 = vadd.f32 %v738_v55, %v306_v47 }
 0x195   :  { %v817_v48 = vpop.f32.mrf.mxu0 }
 0x196   :  { %v310_v60 = vmax.f32 %v307_v57, 0.0 }
 0x19b   :  { %v555_v50 = vpop.f32.mrf.mxu1 }
 0x19c   :  { %v556_v51 = vadd.f32 %v743_v49, %v555_v50 }
 0x19d   :  { %v850_v52 = vpop.f32.mrf.mxu1 }
 0x19e   :  { %v559_v53 = vmax.f32 %v556_v51, 0.0 }
 0x1a0   :  { %860 = vmatmul.mubr.msk.f32.vlgmr.msra.gmra.mxu0 %vm564_vm5, %v559_v53 }
 0x1a1   :  { %863 = vmatpush3.msra.mxu0 %v314_v54  ;;  %870 = vmatprep.mubr.msk.f32.mxu0 %vm899_vm1, %v898_v2 }
 0x1a2   :  { %864 = vmatprep.subr.mxu0 %v898_v2 }
 0x1a3   :  { %865 = vmatpush3.msra.mxu0 %v313_v56 }
 0x1a4   :  { %866 = vmatprep.subr.mxu0 %v898_v2 }
 0x1a5   :  { %867 = vmatpush3.msra.mxu0 %v312_v58 }
 0x1a6   :  { %868 = vmatprep.subr.mxu0 %v898_v2 }
 0x1a7   :  { %869 = vmatpush3.msra.mxu0 %v311_v59 }
 0x1a8   :  { %871 = vmatmul.mubr.msk.f32.vlgmr.msra.gmra.mxu0 %vm564_vm5, %v310_v60 }
 0x260   :  { %v634_v61 = vpop.f32.mrf.mxu0 }
 0x262   :  { %v861_v62 = vpop.f32.mrf.mxu0 }
 0x268   :  { %v707_v63 = vpop.f32.mrf.mxu0 }
 0x269   :  { %v708_v1 = vadd.f32 %v707_v63, %v634_v61 }
 0x26a   :  { %v872_v3 = vpop.f32.mrf.mxu0 }
 0x26b   :  { %v718_v4 = vadd.f32 %v747_v0, %v708_v1 }
 0x26d   :  { %719 = vst [vmem:[#allocation2] sm:$0xff] %v718_v4 }
 0x26e   :  { %887 = shalt.err (!%p884_p4)
}
 0x26f   :  { %729 = dma.vmem_to_hbm [thread:$0]  %s727_s28, 128, %s1174_s16, [#allocation3]  }
 0x270   :  { %896 = dma.done.wait [#allocation3], 128  }
 0x271   :  { %897 = vsyncadd [#allocation3], 4294967168 }
 0x272   :  { %733 = vsyncpa [#allocation3], 1 }

</bundles_post_ra>
